<compile_context>
chip_gen: v5e
topology: v5e:2x2
jax: 0.10.0
libtpu: 0.0.40
codegen_flags: <defaults>
</compile_context>

<pallas_src>
import jax
import jax.numpy as jnp
from jax import lax
from jax.experimental import pallas as pl
from jax.experimental.pallas import tpu as pltpu

N_LETTERS = 57          # char-RNN tutorial alphabet size
HIDDEN_SIZE = 128
OUTPUT_SIZE = 18        # e.g. 18 language categories

N_PAD = 128             # input one-hot padded to a full lane tile
LOGIT_PAD = 128         # logits padded to a full lane tile
NEG_BIG = -1.0e30       # bias for padded logit lanes (exp -> 0)
SUBLANE = 8


def _round_up(x, m):
    return (x + m - 1) // m * m


# -----------------------------------------------------------------------------
# Kernel: one invocation == the whole sequence.  Weights resident in VMEM,
# hidden state carried as a fori_loop value (vregs), logits only at the end.
# -----------------------------------------------------------------------------
def rnn_seq_kernel(x_ref, h0_ref, wxh_ref, whh_ref, wxo_ref, who_ref,
                   bh_ref, bo_ref, out_ref, hid_ref):
    seq = x_ref.shape[0]          # static (trace-time) sequence length
    b_pad = h0_ref.shape[0]

    # Hoist the bias broadcast out of the loop (no CSE of broadcast_in_dim).
    bias_h = jnp.broadcast_to(bh_ref[...], (b_pad, HIDDEN_SIZE))

    def hidden_step(x_t, h):
        # x_t is bf16 one-hot (exact); cast to f32, accumulate in f32.
        x32 = x_t.astype(jnp.float32)
        return (jnp.dot(x32, wxh_ref[...], preferred_element_type=jnp.float32)
                + jnp.dot(h, whh_ref[...], preferred_element_type=jnp.float32)
                + bias_h)

    h = h0_ref[...]
    if seq > 1:  # trace-time constant; short fixed trip count -> unroll
        h = lax.fori_loop(0, seq - 1,
                          lambda t, hc: hidden_step(x_ref[t], hc),
                          h, unroll=True)

    # Final step: new hidden AND logits from combined = [x_last, h_prev].
    x_last = x_ref[seq - 1].astype(jnp.float32)
    h_new = (jnp.dot(x_last, wxh_ref[...], preferred_element_type=jnp.float32)
             + jnp.dot(h, whh_ref[...], preferred_element_type=jnp.float32)
             + bias_h)
    logits = (jnp.dot(x_last, wxo_ref[...], preferred_element_type=jnp.float32)
              + jnp.dot(h, who_ref[...], preferred_element_type=jnp.float32)
              + bo_ref[...])          # (b_pad, 128); padded lanes ~ -1e30

    # Numerically stable log-softmax (padded lanes contribute exp() == 0).
    m = jnp.max(logits, axis=1, keepdims=True)
    shifted = logits - m
    lse = jnp.log(jnp.sum(jnp.exp(shifted), axis=1, keepdims=True))
    out_ref[...] = (shifted - lse).astype(out_ref.dtype)
    hid_ref[...] = h_new.astype(hid_ref.dtype)


def _fused_call(x_seq, h0, wxh, whh, wxo, who, bh, bo):
    """x_seq: (seq, B_pad, N_PAD) bf16, h0: (B_pad, HIDDEN_SIZE) f32."""
    b_pad = h0.shape[0]
    vmem = pl.BlockSpec(memory_space=pltpu.MemorySpace.VMEM)
    return pl.pallas_call(
        rnn_seq_kernel,
        out_shape=(
            jax.ShapeDtypeStruct((b_pad, LOGIT_PAD), jnp.float32),
            jax.ShapeDtypeStruct((b_pad, HIDDEN_SIZE), jnp.float32),
        ),
        in_specs=[vmem] * 8,
        out_specs=(vmem, vmem),
    )(x_seq, h0, wxh, whh, wxo, who, bh, bo)


# -----------------------------------------------------------------------------
# Public wrappers (pad batch to 8 sublanes / input lanes to 128, strip after).
# -----------------------------------------------------------------------------
@jax.jit
def rnn_step(x, h, params):
    """One RNN step (module forward): returns (log_softmax_output, new_hidden)."""
    wxh, whh, wxo, who, bh, bo = params
    B = x.shape[0]
    b_pad = _round_up(max(B, SUBLANE), SUBLANE)
    x_seq = jnp.zeros((1, b_pad, N_PAD), jnp.bfloat16)
    x_seq = x_seq.at[0, :B, :N_LETTERS].set(x.astype(jnp.bfloat16))
    h0 = jnp.zeros((b_pad, HIDDEN_SIZE), jnp.float32).at[:B].set(h)
    out, hid = _fused_call(x_seq, h0, wxh, whh, wxo, who, bh, bo)
    return out[:B, :OUTPUT_SIZE], hid[:B]


@jax.jit
def process_name(name_onehots, init_hidden, params):
    """Whole-sequence loop fused into ONE kernel launch (mirrors process_name)."""
    wxh, whh, wxo, who, bh, bo = params
    B, seq, _ = name_onehots.shape
    b_pad = _round_up(max(B, SUBLANE), SUBLANE)
    x_seq = jnp.zeros((seq, b_pad, N_PAD), jnp.bfloat16)
    x_seq = x_seq.at[:, :B, :N_LETTERS].set(
        jnp.transpose(name_onehots, (1, 0, 2)).astype(jnp.bfloat16))
    h0 = jnp.zeros((b_pad, HIDDEN_SIZE), jnp.float32).at[:B].set(init_hidden)
    out, hid = _fused_call(x_seq, h0, wxh, whh, wxo, who, bh, bo)
    return out[:B, :OUTPUT_SIZE], hid[:B]


# -----------------------------------------------------------------------------
# Parameter init / packing
# -----------------------------------------------------------------------------
def init_raw_params(key):
    """nn.Linear-style init.  Weights stored (in_features, out_features)."""
    in_features = N_LETTERS + HIDDEN_SIZE
    k1, k2, k3, k4 = jax.random.split(key, 4)
    bound = 1.0 / float(in_features) ** 0.5
    w_ih = jax.random.uniform(k1, (in_features, HIDDEN_SIZE),
                              jnp.float32, -bound, bound)
    b_ih = jax.random.uniform(k2, (HIDDEN_SIZE,), jnp.float32, -bound, bound)
    w_io = jax.random.uniform(k3, (in_features, OUTPUT_SIZE),
                              jnp.float32, -bound, bound)
    b_io = jax.random.uniform(k4, (OUTPUT_SIZE,), jnp.float32, -bound, bound)
    return w_ih, b_ih, w_io, b_io


def pack_params(w_ih, b_ih, w_io, b_io):
    """Split into hidden-only / logit-only lane-dense blocks (f32)."""
    pad_cols = LOGIT_PAD - OUTPUT_SIZE
    wxh = jnp.pad(w_ih[:N_LETTERS], ((0, N_PAD - N_LETTERS), (0, 0)))   # (128,128)
    whh = w_ih[N_LETTERS:]                                              # (128,128)
    wxo = jnp.pad(w_io[:N_LETTERS], ((0, N_PAD - N_LETTERS), (0, pad_cols)))
    who = jnp.pad(w_io[N_LETTERS:], ((0, 0), (0, pad_cols)))
    bh = b_ih[None, :]                                                  # (1,128)
    bo = jnp.pad(b_io, ((0, pad_cols),), constant_values=NEG_BIG)[None, :]
    return wxh, whh, wxo, who, bh, bo


# -----------------------------------------------------------------------------
# Pure-JAX reference (mirrors the torch module exactly)
# -----------------------------------------------------------------------------
def reference_process(name_onehots, init_hidden, w_ih, b_ih, w_io, b_io):
    h = init_hidden
    out = None
    for i in range(name_onehots.shape[1]):
        combined = jnp.concatenate([name_onehots[:, i], h], axis=1)
        h_new = combined @ w_ih + b_ih
        logits = combined @ w_io + b_io
        out = jax.nn.log_softmax(logits, axis=1)
        h = h_new
    return out, h


if __name__ == "__main__":
    key = jax.random.PRNGKey(0)
    kp, kx = jax.random.split(key, 2)

    raw = init_raw_params(kp)
    params = pack_params(*raw)

    B, SEQ = 2, 8
    name = jax.nn.one_hot(
        jax.random.randint(kx, (B, SEQ), 0, N_LETTERS), N_LETTERS,
        dtype=jnp.float32)                            # (B, SEQ, N_LETTERS)
    init_hidden = jnp.zeros((B, HIDDEN_SIZE), jnp.float32)

    # single step (the module's forward)
    out1, hid1 = rnn_step(name[:, 0], init_hidden, params)
    jax.block_until_ready((out1, hid1))

    # full sequence fused into one pallas_call (process_name)
    out_seq, hid_seq = process_name(name, init_hidden, params)
    jax.block_until_ready((out_seq, hid_seq))

    # correctness vs pure-JAX reference
    ref_out1, ref_hid1 = reference_process(name[:, :1], init_hidden, *raw)
    ref_out, ref_hid = reference_process(name, init_hidden, *raw)

    assert out1.shape == (B, OUTPUT_SIZE) and hid1.shape == (B, HIDDEN_SIZE)
    assert out_seq.shape == (B, OUTPUT_SIZE) and hid_seq.shape == (B, HIDDEN_SIZE)
    assert bool(jnp.allclose(out1, ref_out1, atol=1e-4, rtol=1e-4))
    assert bool(jnp.allclose(hid1, ref_hid1, atol=1e-4, rtol=1e-4))
    assert bool(jnp.allclose(out_seq, ref_out, atol=1e-4, rtol=1e-4))
    assert bool(jnp.allclose(hid_seq, ref_hid, atol=1e-4, rtol=1e-4))
    # log_softmax rows sum to 1 in prob space
    assert bool(jnp.all(jnp.abs(jnp.sum(jnp.exp(out_seq), axis=1) - 1.0) < 1e-4))

    print("KERNEL_OK")
</pallas_src>

<mosaic_0001>
module attributes {stable_mosaic.version = 11 : i64} {
  func.func @rnn_seq_kernel(%arg0: memref<1x8x128xbf16, #tpu.memory_space<vmem>>, %arg1: memref<8x128xf32, #tpu.memory_space<vmem>>, %arg2: memref<128x128xf32, #tpu.memory_space<vmem>>, %arg3: memref<128x128xf32, #tpu.memory_space<vmem>>, %arg4: memref<128x128xf32, #tpu.memory_space<vmem>>, %arg5: memref<128x128xf32, #tpu.memory_space<vmem>>, %arg6: memref<1x128xf32, #tpu.memory_space<vmem>>, %arg7: memref<1x128xf32, #tpu.memory_space<vmem>>, %arg8: memref<8x128xf32, #tpu.memory_space<vmem>>, %arg9: memref<8x128xf32, #tpu.memory_space<vmem>>) attributes {dimension_semantics = [], scalar_prefetch = 0 : i64, scratch_operands = 0 : i64, tpu.core_type = #tpu.core_type<tc>} {
    %c0 = arith.constant 0 : index
    %c0_0 = arith.constant 0 : index
    %0 = vector.load %arg6[%c0, %c0_0] : memref<1x128xf32, #tpu.memory_space<vmem>>, vector<1x128xf32>
    %1 = vector.shape_cast %0 : vector<1x128xf32> to vector<1x128xf32>
    %2 = vector.broadcast %1 : vector<1x128xf32> to vector<8x128xf32>
    %c0_1 = arith.constant 0 : index
    %c0_2 = arith.constant 0 : index
    %3 = vector.load %arg1[%c0_1, %c0_2] : memref<8x128xf32, #tpu.memory_space<vmem>>, vector<8x128xf32>
    %c0_3 = arith.constant 0 : index
    %c0_4 = arith.constant 0 : index
    %c0_5 = arith.constant 0 : index
    %4 = vector.load %arg0[%c0_3, %c0_4, %c0_5] : memref<1x8x128xbf16, #tpu.memory_space<vmem>>, vector<1x8x128xbf16>
    %5 = vector.shape_cast %4 : vector<1x8x128xbf16> to vector<8x128xbf16>
    %6 = arith.extf %5 : vector<8x128xbf16> to vector<8x128xf32>
    %c0_6 = arith.constant 0 : index
    %c0_7 = arith.constant 0 : index
    %7 = vector.load %arg2[%c0_6, %c0_7] : memref<128x128xf32, #tpu.memory_space<vmem>>, vector<128x128xf32>
    %cst = arith.constant dense<0.000000e+00> : vector<8x128xf32>
    %8 = tpu.matmul %6, %7, %cst {dimension_numbers = #tpu.dot_dimension_numbers<[1], [0], [0], [1], [0, 0, 1, 1], [], []>} : vector<8x128xf32>, vector<128x128xf32>, vector<8x128xf32> -> vector<8x128xf32>
    %c0_8 = arith.constant 0 : index
    %c0_9 = arith.constant 0 : index
    %9 = vector.load %arg3[%c0_8, %c0_9] : memref<128x128xf32, #tpu.memory_space<vmem>>, vector<128x128xf32>
    %cst_10 = arith.constant dense<0.000000e+00> : vector<8x128xf32>
    %10 = tpu.matmul %3, %9, %cst_10 {dimension_numbers = #tpu.dot_dimension_numbers<[1], [0], [0], [1], [0, 0, 1, 1], [], []>} : vector<8x128xf32>, vector<128x128xf32>, vector<8x128xf32> -> vector<8x128xf32>
    %11 = arith.addf %8, %10 : vector<8x128xf32>
    %12 = arith.addf %11, %2 : vector<8x128xf32>
    %c0_11 = arith.constant 0 : index
    %c0_12 = arith.constant 0 : index
    %13 = vector.load %arg4[%c0_11, %c0_12] : memref<128x128xf32, #tpu.memory_space<vmem>>, vector<128x128xf32>
    %cst_13 = arith.constant dense<0.000000e+00> : vector<8x128xf32>
    %14 = tpu.matmul %6, %13, %cst_13 {dimension_numbers = #tpu.dot_dimension_numbers<[1], [0], [0], [1], [0, 0, 1, 1], [], []>} : vector<8x128xf32>, vector<128x128xf32>, vector<8x128xf32> -> vector<8x128xf32>
    %c0_14 = arith.constant 0 : index
    %c0_15 = arith.constant 0 : index
    %15 = vector.load %arg5[%c0_14, %c0_15] : memref<128x128xf32, #tpu.memory_space<vmem>>, vector<128x128xf32>
    %cst_16 = arith.constant dense<0.000000e+00> : vector<8x128xf32>
    %16 = tpu.matmul %3, %15, %cst_16 {dimension_numbers = #tpu.dot_dimension_numbers<[1], [0], [0], [1], [0, 0, 1, 1], [], []>} : vector<8x128xf32>, vector<128x128xf32>, vector<8x128xf32> -> vector<8x128xf32>
    %17 = arith.addf %14, %16 : vector<8x128xf32>
    %c0_17 = arith.constant 0 : index
    %c0_18 = arith.constant 0 : index
    %18 = vector.load %arg7[%c0_17, %c0_18] : memref<1x128xf32, #tpu.memory_space<vmem>>, vector<1x128xf32>
    %19 = vector.broadcast %18 : vector<1x128xf32> to vector<8x128xf32>
    %20 = arith.addf %17, %19 : vector<8x128xf32>
    %cst_19 = arith.constant dense<0xFF800000> : vector<8xf32>
    %21 = vector.multi_reduction <maximumf>, %20, %cst_19 [1] : vector<8x128xf32> to vector<8xf32>
    %22 = vector.shape_cast %21 : vector<8xf32> to vector<8x1xf32>
    %23 = vector.broadcast %22 : vector<8x1xf32> to vector<8x128xf32>
    %24 = arith.subf %20, %23 : vector<8x128xf32>
    %25 = math.exp %24 : vector<8x128xf32>
    %cst_20 = arith.constant dense<0.000000e+00> : vector<8xf32>
    %26 = vector.multi_reduction <add>, %25, %cst_20 [1] : vector<8x128xf32> to vector<8xf32>
    %27 = vector.shape_cast %26 : vector<8xf32> to vector<8x1xf32>
    %28 = math.log %27 : vector<8x1xf32>
    %29 = vector.broadcast %28 : vector<8x1xf32> to vector<8x128xf32>
    %30 = arith.subf %24, %29 : vector<8x128xf32>
    %c0_21 = arith.constant 0 : index
    %c0_22 = arith.constant 0 : index
    %31 = vector.load %arg8[%c0_21, %c0_22] : memref<8x128xf32, #tpu.memory_space<vmem>>, vector<8x128xf32>
    tpu.vector_store %arg8[%c0_21, %c0_22], %30 {strides = array<i32>} : memref<8x128xf32, #tpu.memory_space<vmem>>, vector<8x128xf32>,
    %c0_23 = arith.constant 0 : index
    %c0_24 = arith.constant 0 : index
    %32 = vector.load %arg9[%c0_23, %c0_24] : memref<8x128xf32, #tpu.memory_space<vmem>>, vector<8x128xf32>
    tpu.vector_store %arg9[%c0_23, %c0_24], %12 {strides = array<i32>} : memref<8x128xf32, #tpu.memory_space<vmem>>, vector<8x128xf32>,
    return
  }
}

</mosaic_0001>

<bundles_post_ra>
// kernel: rnn_step.1
= control target key start
LH: loop header
LB: loop body
LE: loop exit
PB: predicated region body
PF: predicated region fallthrough
CT: control target
= control target key end

     0   :  { %15 = vsyncpa [#allocation3], 0  ;;  %s485_s0 = inlined_call_operand.vmem [shape: bf16[1,8,128], index: 0, kind: input, shape index: {}]   ;;  %s486_s1 = inlined_call_operand.vmem [shape: f32[8,128], index: 1, kind: input, shape index: {}]   ;;  %s487_s2 = inlined_call_operand.hbm [shape: f32[128,128], index: 2, kind: input, shape index: {}]   ;;  %s488_s3 = inlined_call_operand.hbm [shape: f32[128,128], index: 3, kind: input, shape index: {}]   ;;  %s489_s4 = inlined_call_operand.hbm [shape: f32[128,128], index: 4, kind: input, shape index: {}]   ;;  %s490_s5 = inlined_call_operand.hbm [shape: f32[128,128], index: 5, kind: input, shape index: {}]   ;;  %s491_s6 = inlined_call_operand.vmem [shape: f32[1,128], index: 6, kind: input, shape index: {}]   ;;  %s492_s7 = inlined_call_operand.vmem [shape: f32[1,128], index: 7, kind: input, shape index: {}]   ;;  %s493_s8 = inlined_call_operand.vmem [shape: f32[8,128], index: 8, kind: output, shape index: {0}]   ;;  %s494_s9 = inlined_call_operand.vmem [shape: f32[8,128], index: 9, kind: output, shape index: {1}]  }
   0x1   :  { %16 = vsyncpa [#allocation5], 0 }
   0x2   :  { %17 = vsyncpa [#allocation8], 0  ;;  %s39_s11 = sshll.u32 %s488_s3, 4  ;;  %s388_s12 = smov [#allocation4]   ;;  %s40_s11 = int_to_ptr.hbm [resolvable:$true] %s39_s11 }
   0x3   :  { %s41_s13 = sshll.u32 %s388_s12, 4  ;;  %s26_s16 = sshll.u32 %s487_s2, 4  ;;  %s42_s13 = int_to_ptr.vmem [resolvable:$true] %s41_s13  ;;  %s27_s16 = int_to_ptr.hbm [resolvable:$true] %s26_s16 }
   0x4   :  { %s389_s17 = smov 128   ;;  %s390_s18 = smov 8  }
   0x5   :  { %47 = dma.hbm_to_vmem [thread:$0]  %s40_s11, 2048, %s42_s13, [#allocation5], %s389_s17, %s389_s17, %s390_s18  }
   0x6   :  { %s391_s19 = smov [#allocation2]   ;;  %s52_s23 = sshll.u32 %s489_s4, 4  ;;  %s53_s23 = int_to_ptr.hbm [resolvable:$true] %s52_s23 }
   0x7   :  { %s28_s20 = sshll.u32 %s391_s19, 4  ;;  %s65_s25 = sshll.u32 %s490_s5, 4  ;;  %s29_s20 = int_to_ptr.vmem [resolvable:$true] %s28_s20  ;;  %s66_s25 = int_to_ptr.hbm [resolvable:$true] %s65_s25 }
   0x8   :  { %34 = dma.hbm_to_vmem [thread:$0]  %s27_s16, 2048, %s29_s20, [#allocation3], %s389_s17, %s389_s17, %s390_s18  }
   0x9   :  { %s392_s26 = smov [#allocation6]   ;;  %s393_s2 = smov [#allocation7]  }
   0xa   :  { %s54_s27 = sshll.u32 %s392_s26, 4  ;;  %s67_s28 = sshll.u32 %s393_s2, 4  ;;  %s55_s27 = int_to_ptr.vmem [resolvable:$true] %s54_s27  ;;  %s68_s28 = int_to_ptr.vmem [resolvable:$true] %s67_s28 }
   0xb   :  { %60 = dma.hbm_to_vmem [thread:$0]  %s53_s23, 2048, %s55_s27, [#allocation5], %s389_s17, %s389_s17, %s390_s18  }
   0xc   :  { %73 = dma.hbm_to_vmem [thread:$0]  %s66_s25, 2048, %s68_s28, [#allocation8], %s389_s17, %s389_s17, %s390_s18  }
   0xd   :  { %382 = dma.done.wait [#allocation3], 2048  }
   0xe   :  { %383 = vsyncadd [#allocation3], 4294965248 }
   0xf   :  { %384 = dma.done.wait [#allocation5], 4096  }
  0x10   :  { %385 = vsyncadd [#allocation5], 4294963200 }
  0x11   :  { %386 = dma.done.wait [#allocation8], 2048  }
  0x12   :  { %387 = vsyncadd [#allocation8], 4294965248  ;;  %v205_v0 = vld [vmem:[#allocation7 + $0x78] sm:$0xff]  ;;  %v204_v2 = vld [vmem:[#allocation7 + $0x70] sm:$0xff] }
  0x13   :  { %v189_v1 = vld [vmem:[#allocation6 + $0x78] sm:$0xff]  ;;  %206 = vmatpush.msra.mxu2 %v205_v0  ;;  %v188_v3 = vld [vmem:[#allocation6 + $0x70] sm:$0xff]  ;;  %v203_v4 = vld [vmem:[#allocation7 + $0x68] sm:$0xff] }
  0x14   :  { %226 = vmatpush.msra.mxu3 %v189_v1  ;;  %v187_v5 = vld [vmem:[#allocation6 + $0x68] sm:$0xff]  ;;  %v202_v6 = vld [vmem:[#allocation7 + $0x60] sm:$0xff]  ;;  %v201_v8 = vld [vmem:[#allocation7 + $0x58] sm:$0xff] }
  0x15   :  { %207 = vmatpush.msra.mxu2 %v204_v2  ;;  %v186_v7 = vld [vmem:[#allocation6 + $0x60] sm:$0xff]  ;;  %v185_v9 = vld [vmem:[#allocation6 + $0x58] sm:$0xff]  ;;  %v200_v10 = vld [vmem:[#allocation7 + $0x50] sm:$0xff] }
  0x16   :  { %227 = vmatpush.msra.mxu3 %v188_v3  ;;  %v184_v11 = vld [vmem:[#allocation6 + $0x50] sm:$0xff]  ;;  %v199_v12 = vld [vmem:[#allocation7 + $0x48] sm:$0xff]  ;;  %v198_v14 = vld [vmem:[#allocation7 + $0x40] sm:$0xff] }
  0x17   :  { %208 = vmatpush.msra.mxu2 %v203_v4  ;;  %v183_v13 = vld [vmem:[#allocation6 + $0x48] sm:$0xff]  ;;  %v182_v15 = vld [vmem:[#allocation6 + $0x40] sm:$0xff]  ;;  %v197_v16 = vld [vmem:[#allocation7 + $0x38] sm:$0xff] }
  0x18   :  { %228 = vmatpush.msra.mxu3 %v187_v5  ;;  %v181_v17 = vld [vmem:[#allocation6 + $0x38] sm:$0xff]  ;;  %v196_v18 = vld [vmem:[#allocation7 + $0x30] sm:$0xff]  ;;  %v195_v20 = vld [vmem:[#allocation7 + $0x28] sm:$0xff] }
  0x19   :  { %209 = vmatpush.msra.mxu2 %v202_v6  ;;  %v180_v19 = vld [vmem:[#allocation6 + $0x30] sm:$0xff]  ;;  %v179_v21 = vld [vmem:[#allocation6 + $0x28] sm:$0xff]  ;;  %v194_v22 = vld [vmem:[#allocation7 + $0x20] sm:$0xff] }
  0x1a   :  { %229 = vmatpush.msra.mxu3 %v186_v7  ;;  %v178_v23 = vld [vmem:[#allocation6 + $0x20] sm:$0xff]  ;;  %v193_v24 = vld [vmem:[#allocation7 + $0x18] sm:$0xff]  ;;  %v192_v26 = vld [vmem:[#allocation7 + $0x10] sm:$0xff] }
  0x1b   :  { %210 = vmatpush.msra.mxu2 %v201_v8  ;;  %v177_v25 = vld [vmem:[#allocation6 + $0x18] sm:$0xff]  ;;  %v176_v27 = vld [vmem:[#allocation6 + $0x10] sm:$0xff]  ;;  %v459_v28 = vld [vmem:[%s485_s0] sm:$0xf] }
  0x1c   :  { %230 = vmatpush.msra.mxu3 %v185_v9  ;;  %v191_v29 = vld [vmem:[#allocation7 + $0x8] sm:$0xff]  ;;  %v190_v31 = vld [vmem:[#allocation7] sm:$0xff]  ;;  %v100_v33 = vunpack.c.l.bf16 %v459_v28  ;;  %v132_v35 = vld [vmem:[#allocation4 + $0x78] sm:$0xff] }
  0x1d   :  { %211 = vmatpush.msra.mxu2 %v200_v10  ;;  %v175_v30 = vld [vmem:[#allocation6 + $0x8] sm:$0xff]  ;;  %v174_v32 = vld [vmem:[#allocation6] sm:$0xff]  ;;  %v116_v36 = vld [vmem:[#allocation2 + $0x78] sm:$0xff]  ;;  %133 = vmatpush.msra.mxu0 %v132_v35 }
  0x1e   :  { %231 = vmatpush.msra.mxu3 %v184_v11  ;;  %v465_v34 = vld [vmem:[%s486_s1] sm:$0xff]  ;;  %v131_v37 = vld [vmem:[#allocation4 + $0x70] sm:$0xff]  ;;  %153 = vmatpush.msra.mxu1 %v116_v36  ;;  %v130_v39 = vld [vmem:[#allocation4 + $0x68] sm:$0xff] }
  0x1f   :  { %212 = vmatpush.msra.mxu2 %v199_v12  ;;  %v115_v38 = vld [vmem:[#allocation2 + $0x70] sm:$0xff]  ;;  %v114_v40 = vld [vmem:[#allocation2 + $0x68] sm:$0xff]  ;;  %134 = vmatpush.msra.mxu0 %v131_v37  ;;  %v129_v41 = vld [vmem:[#allocation4 + $0x60] sm:$0xff] }
  0x20   :  { %232 = vmatpush.msra.mxu3 %v183_v13  ;;  %154 = vmatpush.msra.mxu1 %v115_v38  ;;  %v113_v42 = vld [vmem:[#allocation2 + $0x60] sm:$0xff]  ;;  %v128_v43 = vld [vmem:[#allocation4 + $0x58] sm:$0xff]  ;;  %v127_v45 = vld [vmem:[#allocation4 + $0x50] sm:$0xff] }
  0x21   :  { %213 = vmatpush.msra.mxu2 %v198_v14  ;;  %135 = vmatpush.msra.mxu0 %v130_v39  ;;  %v112_v44 = vld [vmem:[#allocation2 + $0x58] sm:$0xff]  ;;  %v111_v46 = vld [vmem:[#allocation2 + $0x50] sm:$0xff]  ;;  %v126_v47 = vld [vmem:[#allocation4 + $0x48] sm:$0xff] }
  0x22   :  { %233 = vmatpush.msra.mxu3 %v182_v15  ;;  %155 = vmatpush.msra.mxu1 %v114_v40  ;;  %v110_v48 = vld [vmem:[#allocation2 + $0x48] sm:$0xff]  ;;  %v125_v49 = vld [vmem:[#allocation4 + $0x40] sm:$0xff]  ;;  %v124_v51 = vld [vmem:[#allocation4 + $0x38] sm:$0xff] }
  0x23   :  { %214 = vmatpush.msra.mxu2 %v197_v16  ;;  %136 = vmatpush.msra.mxu0 %v129_v41  ;;  %v109_v50 = vld [vmem:[#allocation2 + $0x40] sm:$0xff]  ;;  %v108_v52 = vld [vmem:[#allocation2 + $0x38] sm:$0xff]  ;;  %v123_v53 = vld [vmem:[#allocation4 + $0x30] sm:$0xff] }
  0x24   :  { %234 = vmatpush.msra.mxu3 %v181_v17  ;;  %156 = vmatpush.msra.mxu1 %v113_v42  ;;  %v107_v54 = vld [vmem:[#allocation2 + $0x30] sm:$0xff]  ;;  %v122_v55 = vld [vmem:[#allocation4 + $0x28] sm:$0xff]  ;;  %v121_v57 = vld [vmem:[#allocation4 + $0x20] sm:$0xff] }
  0x25   :  { %215 = vmatpush.msra.mxu2 %v196_v18  ;;  %137 = vmatpush.msra.mxu0 %v128_v43  ;;  %v106_v56 = vld [vmem:[#allocation2 + $0x28] sm:$0xff]  ;;  %v105_v58 = vld [vmem:[#allocation2 + $0x20] sm:$0xff]  ;;  %v120_v0 = vld [vmem:[#allocation4 + $0x18] sm:$0xff] }
  0x26   :  { %235 = vmatpush.msra.mxu3 %v180_v19  ;;  %157 = vmatpush.msra.mxu1 %v112_v44  ;;  %v280_v59 = vld [vmem:[%s492_s7] ss:$0 sm:$0xff]  ;;  %v104_v1 = vld [vmem:[#allocation2 + $0x18] sm:$0xff]  ;;  %v119_v2 = vld [vmem:[#allocation4 + $0x10] sm:$0xff] }
  0x27   :  { %216 = vmatpush.msra.mxu2 %v195_v20  ;;  %138 = vmatpush.msra.mxu0 %v127_v45  ;;  %v103_v3 = vld [vmem:[#allocation2 + $0x10] sm:$0xff]  ;;  %v118_v4 = vld [vmem:[#allocation4 + $0x8] sm:$0xff]  ;;  %v117_v6 = vld [vmem:[#allocation4] sm:$0xff] }
  0x28   :  { %236 = vmatpush.msra.mxu3 %v179_v21  ;;  %158 = vmatpush.msra.mxu1 %v111_v46  ;;  %v102_v5 = vld [vmem:[#allocation2 + $0x8] sm:$0xff]  ;;  %v101_v7 = vld [vmem:[#allocation2] sm:$0xff] }
  0x29   :  { %217 = vmatpush.msra.mxu2 %v194_v22  ;;  %139 = vmatpush.msra.mxu0 %v126_v47  ;;  %v281_v14 = vld [vmem:[%s491_s6] ss:$0 sm:$0xff] }
  0x2a   :  { %237 = vmatpush.msra.mxu3 %v178_v23  ;;  %159 = vmatpush.msra.mxu1 %v110_v48 }
  0x2b   :  { %218 = vmatpush.msra.mxu2 %v193_v24  ;;  %140 = vmatpush.msra.mxu0 %v125_v49 }
  0x2c   :  { %238 = vmatpush.msra.mxu3 %v177_v25  ;;  %160 = vmatpush.msra.mxu1 %v109_v50 }
  0x2d   :  { %219 = vmatpush.msra.mxu2 %v192_v26  ;;  %141 = vmatpush.msra.mxu0 %v124_v51 }
  0x2e   :  { %239 = vmatpush.msra.mxu3 %v176_v27  ;;  %161 = vmatpush.msra.mxu1 %v108_v52 }
  0x2f   :  { %220 = vmatpush.msra.mxu2 %v191_v29  ;;  %142 = vmatpush.msra.mxu0 %v123_v53 }
  0x30   :  { %240 = vmatpush.msra.mxu3 %v175_v30  ;;  %162 = vmatpush.msra.mxu1 %v107_v54 }
  0x31   :  { %221 = vmatpush.msra.mxu2 %v190_v31  ;;  %143 = vmatpush.msra.mxu0 %v122_v55 }
  0x32   :  { %241 = vmatpush.msra.mxu3 %v174_v32  ;;  %222 = vmatmul.f32.vlgmr.msra.gmra.mxu2 %v465_v34 }
  0x33   :  { %242 = vmatmul.f32.vlgmr.msra.gmra.mxu3 %v100_v33  ;;  %163 = vmatpush.msra.mxu1 %v106_v56 }
  0x34   :  { %144 = vmatpush.msra.mxu0 %v121_v57 }
  0x35   :  { %164 = vmatpush.msra.mxu1 %v105_v58 }
  0x36   :  { %145 = vmatpush.msra.mxu0 %v120_v0 }
  0x37   :  { %165 = vmatpush.msra.mxu1 %v104_v1 }
  0x38   :  { %146 = vmatpush.msra.mxu0 %v119_v2 }
  0x39   :  { %166 = vmatpush.msra.mxu1 %v103_v3 }
  0x3a   :  { %147 = vmatpush.msra.mxu0 %v118_v4 }
  0x3b   :  { %167 = vmatpush.msra.mxu1 %v102_v5 }
  0x3c   :  { %148 = vmatpush.msra.mxu0 %v117_v6 }
  0x3d   :  { %168 = vmatpush.msra.mxu1 %v101_v7  ;;  %149 = vmatmul.f32.vlgmr.msra.gmra.mxu0 %v465_v34 }
  0x3e   :  { %169 = vmatmul.f32.vlgmr.msra.gmra.mxu1 %v100_v33 }
  0xb5   :  { %v223_v60 = vpop.f32.mrf.mxu2 }
  0xb6   :  { %v243_v61 = vpop.f32.mrf.mxu3 }
  0xb7   :  { %v244_v62 = vadd.f32 %v243_v61, %v223_v60 }
  0xb9   :  { %v250_v63 = vadd.f32 %v280_v59, %v244_v62 }
  0xba   :  { %v150_v12 = vpop.f32.mrf.mxu0 }
  0xbb   :  { %251 = vmax.xlane.f32.xlu0 %v250_v63  ;;  %v170_v13 = vpop.f32.mrf.mxu1 }
  0xbc   :  { %v171_v15 = vadd.f32 %v170_v13, %v150_v12 }
  0xbe   :  { %v173_v16 = vadd.f32 %v281_v14, %v171_v15 }
  0xc0   :  { %262 = vst [vmem:[%s494_s9] sm:$0xff] %v173_v16 }
 0x12e   :  { %v252_v8 = vpop.xlane.xlu0 %251 }
 0x12f   :  { %v253_v9 = vsub.f32 %v250_v63, %v252_v8 }
 0x131   :  { %v254_v10 = vmul.f32 1.442695, %v253_v9 }
 0x133   :  { %282 = vpow2.f32 %v254_v10 }
 0x139   :  { %v283_v11 = vpop.eup %282 }
 0x13a   :  { %256 = vadd.xlane.f32.xlu0 %v283_v11 }
 0x1ad   :  { %v257_v17 = vpop.xlane.xlu0 %256 }
 0x1ae   :  { %284 = vlog2.f32 %v257_v17 }
 0x1b4   :  { %v285_v18 = vpop.eup %284 }
 0x1b5   :  { %v259_v19 = vmul.f32 0.6931472, %v285_v18 }
 0x1b7   :  { %v260_v20 = vsub.f32 %v253_v9, %v259_v19 }
 0x1b9   :  { %261 = vst [vmem:[%s493_s8] sm:$0xff] %v260_v20 }
 0x1ba   :  { %271 = vsyncpa [#allocation3], 1 }
 0x1bb   :  { %272 = vsyncpa [#allocation5], 1 }
 0x1bc   :  { %273 = vsyncpa [#allocation8], 1 }

</bundles_post_ra>
